<compile_context>
chip_gen: v5e
topology: v5e:2x2
jax: 0.10.0
libtpu: 0.0.40
codegen_flags: <defaults>
</compile_context>

<pallas_src>
import functools

import jax
import jax.numpy as jnp
from jax import lax
from jax.experimental import pallas as pl
from jax.experimental.pallas import tpu as pltpu


_KERNEL_SIZE = 5
_STRIDE = 3
_CONV_CHANNELS = [(1, 32), (32, 128), (128, 512), (512, 1024), (1024, 1024)]
_LRELU_SLOPE = 0.1
_MIN_W_FOR_PALLAS = 128          # below this, per-step overhead / MXU fill favor XLA
_MAX_FOLDED_CIN = 4096           # sanity cap on H_in*Cin for the folded weight
_MAX_W_TILE = 512                # >=512-wide tiles reach ~85% of HBM roofline (measured, v6e)
_VMEM_LIMIT = 48 * 1024 * 1024   # fits v5e/v6e (128 MiB) and v7x (64 MiB per TensorCore)


def _round_up(x, m):
    return ((x + m - 1) // m) * m


def _choose_w_tile(w):
    """Split W into the fewest tiles <= _MAX_W_TILE, each a multiple of 16 (bf16 sublanes)."""
    n = -(-w // _MAX_W_TILE)
    return _round_up(-(-w // n), 16)


def _conv_h_geometry(h_in, ksize, stride):
    pad = ksize // 2
    return (h_in + 2 * pad - ksize) // stride + 1, pad


def _fold_weight(w, stride, h_in):
    """Fold the (K, 1) conv along H into per-output-row dense weights.

    w: [K, Cin, Cout] -> [H_out, H_in*Cin, Cout] such that
    out[:, ho, :] = x_flat @ W_eff[ho]  with  x_flat[:, hi*Cin + ci] = x[hi, :, ci].
    Waste-free here because H_in (<= period, and <= 4 after conv1) never greatly exceeds K.
    """
    K, cin, cout = w.shape
    h_out, pad = _conv_h_geometry(h_in, K, stride)
    zero = jnp.zeros((cin, cout), w.dtype)
    per_row = []
    for ho in range(h_out):
        blocks = []
        for hi in range(h_in):
            kh = hi - ho * stride + pad
            blocks.append(w[kh] if 0 <= kh < K else zero)
        per_row.append(jnp.concatenate(blocks, axis=0))
    return jnp.stack(per_row, axis=0)


# -----------------------------------------------------------------------------
# Pallas kernel: folded conv = one MXU matmul per output row + fused epilogue
# -----------------------------------------------------------------------------
def _folded_conv_kernel(x_ref, w_ref, b_ref, o_ref, *, h_out, cout, slope):
    # x_ref: [1, TW, Cin_eff] bf16    w_ref: [H_out, Cin_eff, Cout] bf16
    # b_ref: [1, Cout] f32            o_ref: [1, TW, H_out*Cout] bf16
    x = x_ref[0]                      # loaded once, reused for every output row
    bias = b_ref[...]                 # hoisted out of the (static, <= 2) ho loop
    for ho in range(h_out):
        # Single MXU pass per output row: contraction over H_in*Cin, f32 accumulation,
        # bias + leaky-ReLU + bf16 cast fused into the (lane-dense, Cout >= 128) store.
        acc = jnp.dot(x, w_ref[ho], preferred_element_type=jnp.float32) + bias
        res = jnp.maximum(acc, slope * acc)               # leaky_relu(slope)
        o_ref[0, :, pl.ds(ho * cout, cout)] = res.astype(o_ref.dtype)


def pallas_folded_conv(x_flat, w_eff, bias, *, w_tile, slope=_LRELU_SLOPE):
    """x_flat: [B, Wp, Cin_eff] (Wp % w_tile == 0); w_eff: [H_out, Cin_eff, Cout]; bias: [Cout].

    Returns leaky_relu(x_flat @ w_eff[ho] + bias) laid out as [B, Wp, H_out*Cout] bf16.
    """
    B, Wp, cin_eff = x_flat.shape
    h_out, cin_eff_w, cout = w_eff.shape
    assert cin_eff == cin_eff_w and Wp % w_tile == 0 and cin_eff <= _MAX_FOLDED_CIN

    # W tiles lead so the v7x megacore has >= 2 units of work even when B == 1.  No Cout
    # axis: activation is read from HBM once; weight/bias block indices are constant so
    # their DMA is issued once per layer.  (Weight <= 2 MiB bf16; double-buffering it plus
    # x/out tiles stays well inside the 48 MiB VMEM budget on every generation.)
    grid = (Wp // w_tile, B)
    kernel = functools.partial(_folded_conv_kernel, h_out=h_out, cout=cout, slope=slope)
    return pl.pallas_call(
        kernel,
        out_shape=jax.ShapeDtypeStruct((B, Wp, h_out * cout), jnp.bfloat16),
        grid=grid,
        in_specs=[
            pl.BlockSpec((1, w_tile, cin_eff), lambda wi, bi: (bi, wi, 0)),
            pl.BlockSpec((h_out, cin_eff, cout), lambda wi, bi: (0, 0, 0)),
            pl.BlockSpec((1, cout), lambda wi, bi: (0, 0)),
        ],
        out_specs=pl.BlockSpec((1, w_tile, h_out * cout), lambda wi, bi: (bi, wi, 0)),
        compiler_params=pltpu.CompilerParams(
            dimension_semantics=("parallel", "parallel"),
            vmem_limit_bytes=_VMEM_LIMIT,
        ),
    )(x_flat.astype(jnp.bfloat16), w_eff.astype(jnp.bfloat16),
      bias.astype(jnp.float32).reshape(1, cout))


def xla_folded_conv(x_flat, w_eff, bias, *, slope=_LRELU_SLOPE):
    """Identical math to pallas_folded_conv (bf16 operands, f32 accumulation), in XLA."""
    B, W, _ = x_flat.shape
    h_out, _, cout = w_eff.shape
    y = jnp.einsum("bwi,hio->bwho", x_flat.astype(jnp.bfloat16),
                   w_eff.astype(jnp.bfloat16), preferred_element_type=jnp.float32)
    y = y + bias.astype(jnp.float32)[None, None, None, :]
    y = jnp.maximum(y, slope * y)
    return y.reshape(B, W, h_out * cout).astype(jnp.bfloat16)


# -----------------------------------------------------------------------------
# Parameters (weight_norm reparametrization applied explicitly)
# -----------------------------------------------------------------------------
def _apply_weight_norm(v, g):
    # PyTorch nn.utils.weight_norm (dim=0): w = g * v / ||v||, per output channel.
    # v layout: [K, Cin, Cout]; the output channel is the last axis.
    norm = jnp.sqrt(jnp.sum(jnp.square(v), axis=(0, 1), keepdims=True))
    return v * (g[None, None, :] / norm)


def init_discriminator_p_params(key):
    """Per-conv (v, g, b); effective weight = g * v / ||v|| (identity at init)."""
    params = {"convs": [], "post": None}
    for cin, cout in _CONV_CHANNELS:
        key, k1, k2 = jax.random.split(key, 3)
        v = 0.05 * jax.random.normal(k1, (_KERNEL_SIZE, cin, cout), jnp.float32)
        g = jnp.sqrt(jnp.sum(jnp.square(v), axis=(0, 1)))
        b = 0.01 * jax.random.normal(k2, (cout,), jnp.float32)
        params["convs"].append((v, g, b))
    key, k1, k2 = jax.random.split(key, 3)
    vp = 0.05 * jax.random.normal(k1, (3, 1024, 1), jnp.float32)
    gp = jnp.sqrt(jnp.sum(jnp.square(vp), axis=(0, 1)))
    bp = 0.01 * jax.random.normal(k2, (1,), jnp.float32)
    params["post"] = (vp, gp, bp)
    return params


# -----------------------------------------------------------------------------
# DiscriminatorP / MultiPeriodDiscriminator forward
# -----------------------------------------------------------------------------
def _feature_map(h_flat, w_true, h_dim, c_dim, nchw):
    """[B, Wp, H*C] -> PyTorch-style NCHW f32 map (or compact [B, W, H, C] bf16)."""
    B = h_flat.shape[0]
    x = h_flat[:, :w_true, :].reshape(B, w_true, h_dim, c_dim)
    if not nchw:
        return x.astype(jnp.bfloat16)
    return jnp.transpose(x, (0, 3, 2, 1)).astype(jnp.float32)   # [B, C, H, W]


@functools.partial(jax.jit, static_argnames=("period", "features_nchw", "enable_pallas"))
def discriminator_p_forward(x, params, *, period, features_nchw=True, enable_pallas=True):
    """DiscriminatorP forward.  x: [B, 1, T] f32.

    Returns (scores [B, Hs*W], feature_maps): 5 conv maps + conv_post output, matching the
    PyTorch module (NCHW f32 by default; compact [B, W, H, C] bf16 if features_nchw=False).
    """
    B, _, T = x.shape
    if T % period != 0:
        pad_t = period - T % period
        x = jnp.pad(x, ((0, 0), (0, 0), (0, pad_t)), mode="reflect")
    Tp = x.shape[-1]
    W = Tp // period
    # PyTorch: x.view(B, 1, period, T'/period); the (5,1)/(3,1) convs run along the
    # `period` (H) axis.  Folded layout: [B, W, H*C] with H adjacent to the channels.
    h = jnp.transpose(x.reshape(B, period, W), (0, 2, 1))        # [B, W, period]  (Cin=1)

    use_pallas = enable_pallas and W >= _MIN_W_FOR_PALLAS
    if use_pallas:
        tw = _choose_w_tile(W)
        Wp = _round_up(W, tw)
        if Wp != W:
            # Nothing mixes along W; padded columns are independent and sliced off below.
            h = jnp.pad(h, ((0, 0), (0, Wp - W), (0, 0)))
    else:
        tw = Wp = W

    feature_maps = []
    h_dim = period                    # current H extent (folded into the channel axis)
    strides = (_STRIDE, _STRIDE, _STRIDE, _STRIDE, 1)
    for i, (v, g, b) in enumerate(params["convs"]):
        w = _apply_weight_norm(v, g)                             # [K, Cin, Cout]
        cout = w.shape[2]
        w_eff = _fold_weight(w, strides[i], h_dim)               # [H_out, H*Cin, Cout]
        h_out, cin_eff = w_eff.shape[0], w_eff.shape[1]
        if i == 0 or not use_pallas or cin_eff > _MAX_FOLDED_CIN:
            # conv1 (Cin=1) is MXU/lane-sparse -> tiny XLA einsum; same path for tiny W.
            h = xla_folded_conv(h, w_eff, b)
        else:
            h = pallas_folded_conv(h, w_eff, b, w_tile=tw)
        h_dim = h_out
        feature_maps.append(_feature_map(h, W, h_dim, cout, features_nchw))

    # conv_post (1024 -> 1, kernel (3,1)): Cout=1 matvec, lane-sparse -> XLA einsum.
    vp, gp, bp = params["post"]
    wp_eff = _fold_weight(_apply_weight_norm(vp, gp), 1, h_dim)  # [Hs, H*1024, 1]
    scores = jnp.einsum("bwi,hio->bwho", h[:, :W, :], wp_eff.astype(h.dtype),
                        preferred_element_type=jnp.float32)
    scores = scores + bp.astype(jnp.float32)[None, None, None, :]          # [B, W, Hs, 1]
    scores_nchw = jnp.transpose(scores, (0, 3, 2, 1)).astype(jnp.float32)  # [B, 1, Hs, W]
    feature_maps.append(scores_nchw if features_nchw else scores.astype(jnp.bfloat16))
    scores_flat = scores_nchw.reshape(B, -1)                     # torch.flatten(scores, 1, -1)
    return scores_flat, feature_maps


def multi_period_discriminator_forward(x, all_params, periods=(2, 3, 5, 7, 11),
                                        features_nchw=True):
    scores, feature_maps = [], []
    for period, prm in zip(periods, all_params):
        s, fm = discriminator_p_forward(x, prm, period=period, features_nchw=features_nchw)
        scores.append(s)
        feature_maps.extend(fm)
    return jnp.concatenate(scores, axis=1), feature_maps


# -----------------------------------------------------------------------------
# Literal NCHW / f32 translation of the PyTorch module (XLA) for validation
# -----------------------------------------------------------------------------
def _reference_discriminator_p(x, params, period):
    B, _, T = x.shape
    if T % period != 0:
        pad_t = period - T % period
        x = jnp.pad(x, ((0, 0), (0, 0), (0, pad_t)), mode="reflect")
    Tp = x.shape[-1]
    h = x.reshape(B, 1, period, Tp // period).astype(jnp.float32)        # NCHW
    fms = []
    strides = (_STRIDE, _STRIDE, _STRIDE, _STRIDE, 1)
    for i, (v, g, b) in enumerate(params["convs"]):
        w = _apply_weight_norm(v, g)                                     # [K, Cin, Cout]
        w_oihw = jnp.transpose(w, (2, 1, 0))[..., None]                  # [Cout, Cin, K, 1]
        h = lax.conv_general_dilated(
            h, w_oihw, window_strides=(strides[i], 1),
            padding=((_KERNEL_SIZE // 2, _KERNEL_SIZE // 2), (0, 0)),
            dimension_numbers=("NCHW", "OIHW", "NCHW"))
        h = h + b[None, :, None, None]
        h = jnp.where(h > 0, h, _LRELU_SLOPE * h)
        fms.append(h)
    vp, gp, bp = params["post"]
    wp_oihw = jnp.transpose(_apply_weight_norm(vp, gp), (2, 1, 0))[..., None]
    s = lax.conv_general_dilated(h, wp_oihw, (1, 1), ((1, 1), (0, 0)),
                                 dimension_numbers=("NCHW", "OIHW", "NCHW"))
    s = s + bp[None, :, None, None]
    fms.append(s)
    return s.reshape(B, -1), fms


def _max_rel_err(a, b):
    a = jnp.asarray(a, jnp.float32)
    b = jnp.asarray(b, jnp.float32)
    return float(jnp.max(jnp.abs(a - b)) / (jnp.max(jnp.abs(b)) + 1e-6))


# -----------------------------------------------------------------------------
if __name__ == "__main__":
    # TODO(synk): loading trained PyTorch checkpoints requires mapping (weight_v, weight_g,
    # bias) with layout [Cout, Cin, K, 1] onto params["convs"]/["post"] as [K, Cin, Cout].
    periods = (2, 3, 5, 7, 11)
    key = jax.random.PRNGKey(0)
    keys = jax.random.split(key, len(periods) + 4)
    all_params = [init_discriminator_p_params(keys[i]) for i in range(len(periods))]

    # --- kernel-level spot check: Pallas folded conv vs identical-math XLA (both bf16) ----
    xt = jax.random.normal(keys[-4], (2, 256, 160), jnp.float32).astype(jnp.bfloat16)
    wt = (0.05 * jax.random.normal(keys[-3], (2, 160, 256), jnp.float32)).astype(jnp.bfloat16)
    bt = 0.01 * jax.random.normal(keys[-2], (256,), jnp.float32)
    got = pallas_folded_conv(xt, wt, bt, w_tile=128).astype(jnp.float32)
    ref = xla_folded_conv(xt, wt, bt).astype(jnp.float32)
    jax.block_until_ready(got)
    assert got.shape == ref.shape == (2, 256, 512)
    kerr = _max_rel_err(got, ref)
    assert kerr < 2e-2, f"Pallas folded conv mismatch vs XLA reference (rel err {kerr})"

    # --- model-level check vs the literal NCHW/f32 PyTorch-style reference ----------------
    # T chosen so W = T/period >= 128 for every period (the Pallas path is active).
    T = 1540
    x = jax.random.normal(keys[-1], (2, 1, T), jnp.float32)
    for p in (2, 7, 11):                       # covers largest W, multi-tap H, H_out = 2
        prm = all_params[periods.index(p)]
        s_pl, fm_pl = discriminator_p_forward(x, prm, period=p)
        s_np, _ = discriminator_p_forward(x, prm, period=p, enable_pallas=False)
        s_rf, fm_rf = _reference_discriminator_p(x, prm, p)
        assert s_pl.shape == s_rf.shape
        # Pallas vs identical-math (bf16) XLA path: tight.
        assert _max_rel_err(s_pl, s_np) < 5e-2, f"period {p}: pallas vs xla-folded mismatch"
        # bf16 Pallas path vs f32 PyTorch-style reference: bf16-level tolerance.
        assert _max_rel_err(s_pl, s_rf) < 0.15, f"period {p}: scores vs reference"
        for li, (a, b) in enumerate(zip(fm_pl, fm_rf)):
            assert a.shape == b.shape, (p, li, a.shape, b.shape)
            e = _max_rel_err(a, b)
            assert e < 0.15, f"period {p} feature map {li}: rel err {e}"

    # --- full MultiPeriodDiscriminator forward (Pallas hot path active) -------------------
    scores, feature_maps = multi_period_discriminator_forward(x, all_params, periods)
    jax.block_until_ready(scores)
    for fm in feature_maps:
        jax.block_until_ready(fm)
    assert scores.shape[0] == 2
    assert len(feature_maps) == len(periods) * 6      # 5 conv maps + conv_post per period

    # --- tiny input: exercises reflect padding + the small-W XLA fallback gate ------------
    x_small = jax.random.normal(keys[-1], (2, 1, 121), jnp.float32)
    s_small, fm_small = multi_period_discriminator_forward(x_small, all_params, periods)
    jax.block_until_ready(s_small)
    assert len(fm_small) == len(periods) * 6

    print("KERNEL_OK")
</pallas_src>

<mosaic_0001>
module attributes {stable_mosaic.version = 11 : i64} {
  func.func @_folded_conv_kernel(%arg0: i32, %arg1: i32, %arg2: memref<1x128x160xbf16, #tpu.memory_space<vmem>>, %arg3: memref<2x160x256xbf16, #tpu.memory_space<vmem>>, %arg4: memref<1x256xf32, #tpu.memory_space<vmem>>, %arg5: memref<1x128x512xbf16, #tpu.memory_space<vmem>>) attributes {dimension_semantics = [#tpu.dimension_semantics<parallel>, #tpu.dimension_semantics<parallel>], iteration_bounds = array<i64: 2, 2>, scalar_prefetch = 0 : i64, scratch_operands = 0 : i64, tpu.core_type = #tpu.core_type<tc>, window_params = [{transform_indices = @transform_0, window_bounds = array<i64: 1, 128, 160>}, {pipeline_mode = #tpu.pipeline_mode<synchronous>, transform_indices = @transform_1, window_bounds = array<i64: 2, 160, 256>}, {pipeline_mode = #tpu.pipeline_mode<synchronous>, transform_indices = @transform_2, window_bounds = array<i64: 1, 256>}, {transform_indices = @transform_3, window_bounds = array<i64: 1, 128, 512>}]} {
    %c0 = arith.constant 0 : index
    %c0_0 = arith.constant 0 : index
    %c0_1 = arith.constant 0 : index
    %0 = vector.load %arg2[%c0, %c0_0, %c0_1] : memref<1x128x160xbf16, #tpu.memory_space<vmem>>, vector<1x128x160xbf16>
    %1 = vector.shape_cast %0 : vector<1x128x160xbf16> to vector<128x160xbf16>
    %c0_2 = arith.constant 0 : index
    %c0_3 = arith.constant 0 : index
    %2 = vector.load %arg4[%c0_2, %c0_3] : memref<1x256xf32, #tpu.memory_space<vmem>>, vector<1x256xf32>
    %c0_4 = arith.constant 0 : index
    %c0_5 = arith.constant 0 : index
    %c0_6 = arith.constant 0 : index
    %3 = vector.load %arg3[%c0_4, %c0_5, %c0_6] : memref<2x160x256xbf16, #tpu.memory_space<vmem>>, vector<1x160x256xbf16>
    %4 = vector.shape_cast %3 : vector<1x160x256xbf16> to vector<160x256xbf16>
    %cst = arith.constant dense<0.000000e+00> : vector<128x256xf32>
    %5 = tpu.matmul %1, %4, %cst {dimension_numbers = #tpu.dot_dimension_numbers<[1], [0], [0], [1], [0, 0, 1, 1], [], []>} : vector<128x160xbf16>, vector<160x256xbf16>, vector<128x256xf32> -> vector<128x256xf32>
    %6 = vector.broadcast %2 : vector<1x256xf32> to vector<128x256xf32>
    %7 = arith.addf %5, %6 : vector<128x256xf32>
    %cst_7 = arith.constant 1.000000e-01 : f32
    %8 = vector.broadcast %cst_7 : f32 to vector<128x256xf32>
    %9 = arith.mulf %8, %7 : vector<128x256xf32>
    %10 = arith.maximumf %7, %9 : vector<128x256xf32>
    %11 = arith.truncf %10 : vector<128x256xf32> to vector<128x256xbf16>
    %c0_8 = arith.constant 0 : index
    %c0_9 = arith.constant 0 : index
    %c0_10 = arith.constant 0 : index
    %12 = vector.load %arg5[%c0_8, %c0_9, %c0_10] : memref<1x128x512xbf16, #tpu.memory_space<vmem>>, vector<1x128x256xbf16>
    %13 = vector.shape_cast %12 : vector<1x128x256xbf16> to vector<128x256xbf16>
    %14 = vector.shape_cast %11 : vector<128x256xbf16> to vector<1x128x256xbf16>
    tpu.vector_store %arg5[%c0_8, %c0_9, %c0_10], %14 {strides = array<i32>} : memref<1x128x512xbf16, #tpu.memory_space<vmem>>, vector<1x128x256xbf16>,
    %c1 = arith.constant 1 : index
    %c0_11 = arith.constant 0 : index
    %c0_12 = arith.constant 0 : index
    %15 = vector.load %arg3[%c1, %c0_11, %c0_12] : memref<2x160x256xbf16, #tpu.memory_space<vmem>>, vector<1x160x256xbf16>
    %16 = vector.shape_cast %15 : vector<1x160x256xbf16> to vector<160x256xbf16>
    %cst_13 = arith.constant dense<0.000000e+00> : vector<128x256xf32>
    %17 = tpu.matmul %1, %16, %cst_13 {dimension_numbers = #tpu.dot_dimension_numbers<[1], [0], [0], [1], [0, 0, 1, 1], [], []>} : vector<128x160xbf16>, vector<160x256xbf16>, vector<128x256xf32> -> vector<128x256xf32>
    %18 = vector.broadcast %2 : vector<1x256xf32> to vector<128x256xf32>
    %19 = arith.addf %17, %18 : vector<128x256xf32>
    %cst_14 = arith.constant 1.000000e-01 : f32
    %20 = vector.broadcast %cst_14 : f32 to vector<128x256xf32>
    %21 = arith.mulf %20, %19 : vector<128x256xf32>
    %22 = arith.maximumf %19, %21 : vector<128x256xf32>
    %23 = arith.truncf %22 : vector<128x256xf32> to vector<128x256xbf16>
    %c0_15 = arith.constant 0 : index
    %c0_16 = arith.constant 0 : index
    %c256 = arith.constant 256 : index
    %24 = vector.load %arg5[%c0_15, %c0_16, %c256] : memref<1x128x512xbf16, #tpu.memory_space<vmem>>, vector<1x128x256xbf16>
    %25 = vector.shape_cast %24 : vector<1x128x256xbf16> to vector<128x256xbf16>
    %26 = vector.shape_cast %23 : vector<128x256xbf16> to vector<1x128x256xbf16>
    tpu.vector_store %arg5[%c0_15, %c0_16, %c256], %26 {strides = array<i32>} : memref<1x128x512xbf16, #tpu.memory_space<vmem>>, vector<1x128x256xbf16>,
    return
  }
  func.func @transform_0(%arg0: i32, %arg1: i32) -> (i32, i32, i32) {
    %c0_i32 = arith.constant 0 : i32
    %c0_i32_0 = arith.constant 0 : i32
    return %arg1, %arg0, %c0_i32 : i32, i32, i32
  }
  func.func @transform_1(%arg0: i32, %arg1: i32) -> (i32, i32, i32) {
    %c0_i32 = arith.constant 0 : i32
    %c0_i32_0 = arith.constant 0 : i32
    %c0_i32_1 = arith.constant 0 : i32
    %c0_i32_2 = arith.constant 0 : i32
    return %c0_i32, %c0_i32_0, %c0_i32_1 : i32, i32, i32
  }
  func.func @transform_2(%arg0: i32, %arg1: i32) -> (i32, i32) {
    %c0_i32 = arith.constant 0 : i32
    %c0_i32_0 = arith.constant 0 : i32
    %c0_i32_1 = arith.constant 0 : i32
    return %c0_i32, %c0_i32_0 : i32, i32
  }
  func.func @transform_3(%arg0: i32, %arg1: i32) -> (i32, i32, i32) {
    %c0_i32 = arith.constant 0 : i32
    %c0_i32_0 = arith.constant 0 : i32
    return %arg1, %arg0, %c0_i32 : i32, i32, i32
  }
}

</mosaic_0001>

<bundles_post_ra>
// kernel: tpu_custom_call.1
= control target key start
LH: loop header
LB: loop body
LE: loop exit
PB: predicated region body
PF: predicated region fallthrough
CT: control target
= control target key end

     0   :  { %8 = vsyncpa [#allocation3], 0  ;;  %s2426_s0 = inlined_call_operand.vmem [shape: bf16[2,256,160], index: 0, kind: input, shape index: {}]   ;;  %s2427_s1 = inlined_call_operand.vmem [shape: bf16[2,160,256], index: 1, kind: input, shape index: {}]   ;;  %s2428_s2 = inlined_call_operand.vmem [shape: f32[1,256], index: 2, kind: input, shape index: {}]   ;;  %s2429_s3 = inlined_call_operand.hbm [shape: bf16[2,256,512], index: 3, kind: output, shape index: {}]  }
   0x1   :  { %10 = vsyncpa [#allocation3 + $0x1], 0  ;;  %s1793_s12 = smov 0   ;;  %s1795_s13 = smov 0  }
   0x2   :  { %s1797_s14 = smov 0   ;;  %s1799_s15 = smov 0  }
   0x3   :  { %s1801_s16 = smov 0   ;;  %s1803_s17 = smov 0  }
   0x4   :  { %s1805_s18 = smov 0   ;;  %s1807_s19 = smov 0  }
   0x5 LB: > { %s1252_s20 = sadd.s32 4294967295, %s1769_s19   ;;  %s1253_s21 = sadd.s32 4294967294, %s1769_s19   ;;  %s1769_s19 = sphi %s1807_s19, %s16_s19   ;;  %s1765_s18 = sphi %s1805_s18, %s2438_s18   ;;  %s1761_s17 = sphi %s1803_s17, %s2437_s17   ;;  %s1757_s16 = sphi %s1801_s16, %s2436_s16   ;;  %s1753_s15 = sphi %s1799_s15, %s2435_s15   ;;  %s1749_s14 = sphi %s1797_s14, %s2434_s14   ;;  %s1745_s13 = sphi %s1795_s13, %s2433_s13   ;;  %s1741_s12 = sphi %s1793_s12, %s2432_s12  }
   0x6   : > { %s25_s22 = sadd.s32 1, %s1761_s17  ;;  %s28_s23 = sadd.s32 1, %s1765_s18 }
   0x7   : > { %p26_p0 = scmp.ge.s32.totalorder %s25_s22, 2  ;;  %p117_p1 = scmp.ne.s32.totalorder %s1749_s14, %s1745_s13 }
   0x8   : > { %p118_p2 = scmp.eq.s32.totalorder %s1252_s20, 3  ;;  %p123_p5 = scmp.ne.s32.totalorder %s1745_s13, %s1741_s12 }
   0x9   : > { %s2440_s22 = smov (%p26_p0, %s25_s22), 0  ;;  %s2442_s23 = smov (!%p26_p0, %s28_s23), %s1765_s18 }
   0xa   : > { %s102_s24 = ssub.s32 %s1761_s17, %s2440_s22  ;;  %p1844_p3 = por %p118_p2, %p117_p1 }
   0xb   : > { %p30_p4 = scmp.ge.s32.totalorder %s2442_s23, 2  ;;  %p124_p6 = scmp.eq.s32.totalorder %s1253_s21, 3 }
   0xc   : > { %p1256_p7 = scmp.ge.s32.totalorder %s1769_s19, 1  ;;  %p162_p9 = scmp.lt.s32.totalorder %s1769_s19, 5 }
   0xd   : > { %s2444_s23 = smov (%p30_p4, %s2442_s23), 0  ;;  %p1853_p8 = por %p124_p6, %p123_p5 }
   0xe   : > { %s103_s27 = ssub.s32 %s1765_s18, %s2444_s23  ;;  %s107_s28 = sadd.s32 1, %s1749_s14 }
   0xf   : > { %s104_s29 = sor.u32 %s103_s27, %s102_s24  ;;  %p163_p10 = pnand %p1256_p7, %p162_p9 }
  0x10   : > { %p105_p11 = scmp.eq.s32.totalorder %s104_s29, 0  ;;  %s1258_s6 = sshll.u32 (!%p163_p10), %s1757_s16, 4 }
  0x11   : > { %166 = sbr.rel (%p163_p10) target bundleno = 449 (0x1c1), region = 32  ;;  %p192_p12 = scmp.lt.s32.totalorder (!%p163_p10), %s1753_s15, 1 }
  0x12   : > { %s1862_s30 = scalar_select %p105_p11, %s1749_s14, %s107_s28  }
  0x13   : > { %p194_p13 = scmp.lt.s32.totalorder (!%p163_p10), %s1258_s6, 31 }
  0x16   : > { %v1384_v0 = vld [vmem:[%s2427_s1 + $0x70] sm:$0xf]  ;;  %v1576_v1 = vld [vmem:[%s2427_s1 + $0x74] sm:$0xf0]  ;;  %v1575_v2 = vld [vmem:[%s2427_s1 + $0x74] sm:$0xf] }
  0x17   : > { %v1385_v3 = vor.u32 %v1576_v1, %v1384_v0  ;;  %v1386_v4 = vld [vmem:[%s2427_s1 + $0x78] sm:$0xf0]  ;;  %v1376_v5 = vld [vmem:[%s2427_s1 + $0x60] sm:$0xf]  ;;  %v1574_v6 = vld [vmem:[%s2427_s1 + $0x64] sm:$0xf0] }
  0x18   : > { %v1389_v7 = vor.u32 %v1575_v2, %v1386_v4  ;;  %v1573_v8 = vld [vmem:[%s2427_s1 + $0x64] sm:$0xf]  ;;  %v1378_v9 = vld [vmem:[%s2427_s1 + $0x68] sm:$0xf0]  ;;  %v1377_v10 = vor.u32 %v1574_v6, %v1376_v5  ;;  %v1368_v12 = vld [vmem:[%s2427_s1 + $0x50] sm:$0xf] }
  0x19   : > { %443 = vmatpush.bf16.msra.mxu0 %v1385_v3  ;;  %v1381_v11 = vor.u32 %v1573_v8, %v1378_v9  ;;  %v1572_v13 = vld [vmem:[%s2427_s1 + $0x54] sm:$0xf0]  ;;  %v1571_v14 = vld [vmem:[%s2427_s1 + $0x54] sm:$0xf]  ;;  %v1370_v15 = vld [vmem:[%s2427_s1 + $0x58] sm:$0xf0] }
  0x1a   : > { %541 = vmatpush.bf16.msra.mxu2 %v1389_v7  ;;  %v1579_v16 = vld [vmem:[%s2427_s1 + $0x94] sm:$0xf]  ;;  %v1402_v17 = vld [vmem:[%s2427_s1 + $0x98] sm:$0xf0]  ;;  %v1369_v19 = vor.u32 %v1572_v13, %v1368_v12  ;;  %v1360_v20 = vld [vmem:[%s2427_s1 + $0x40] sm:$0xf]  ;;  %v1373_v23 = vor.u32 %v1571_v14, %v1370_v15 }
  0x1b   : > { %v1405_v18 = vor.u32 %v1579_v16, %v1402_v17  ;;  %v1400_v21 = vld [vmem:[%s2427_s1 + $0x90] sm:$0xf]  ;;  %v1580_v22 = vld [vmem:[%s2427_s1 + $0x94] sm:$0xf0]  ;;  %v1570_v24 = vld [vmem:[%s2427_s1 + $0x44] sm:$0xf0] }
  0x1c   : > { %v1401_v25 = vor.u32 %v1580_v22, %v1400_v21  ;;  %v1577_v26 = vld [vmem:[%s2427_s1 + $0x84] sm:$0xf]  ;;  %v1394_v27 = vld [vmem:[%s2427_s1 + $0x88] sm:$0xf0]  ;;  %v1392_v31 = vld [vmem:[%s2427_s1 + $0x80] sm:$0xf]  ;;  %v1361_v32 = vor.u32 %v1570_v24, %v1360_v20 }
  0x1d   : > { %444 = vmatpush.bf16.msra.mxu0 %v1377_v10  ;;  %596 = vmatpush.bf16.msra.mxu3 %v1405_v18  ;;  %v1569_v28 = vld [vmem:[%s2427_s1 + $0x44] sm:$0xf]  ;;  %v1362_v29 = vld [vmem:[%s2427_s1 + $0x48] sm:$0xf0]  ;;  %v1397_v30 = vor.u32 %v1577_v26, %v1394_v27  ;;  %v1578_v33 = vld [vmem:[%s2427_s1 + $0x84] sm:$0xf0] }
  0x1e   : > { %542 = vmatpush.bf16.msra.mxu2 %v1381_v11  ;;  %498 = vmatpush.bf16.msra.mxu1 %v1401_v25  ;;  %v1365_v34 = vor.u32 %v1569_v28, %v1362_v29  ;;  %v1352_v35 = vld [vmem:[%s2427_s1 + $0x30] sm:$0xf]  ;;  %v1568_v36 = vld [vmem:[%s2427_s1 + $0x34] sm:$0xf0]  ;;  %s193_s27 = scalar_select %p192_p12, %s1753_s15, 1  ;;  %v1393_v37 = vor.u32 %v1578_v33, %v1392_v31  ;;  %vm418_vm0 = vcmask 261120  }
  0x1f   : > { %v1567_v38 = vld [vmem:[%s2427_s1 + $0x34] sm:$0xf]  ;;  %v1354_v39 = vld [vmem:[%s2427_s1 + $0x38] sm:$0xf0]  ;;  %s2446_s6 = smov (!%p194_p13, %s1258_s6), 31  ;;  %v1353_v41 = vor.u32 %v1568_v36, %v1352_v35 }
  0x20   : > { %v1344_v40 = vld [vmem:[%s2427_s1 + $0x20] sm:$0xf]  ;;  %s1260_s9 = sshll.u32 %s193_s27, 6  ;;  %v1566_v42 = vld [vmem:[%s2427_s1 + $0x24] sm:$0xf0]  ;;  %s1259_s20 = sshll.u32 %s2446_s6, 1  ;;  %v1357_v44 = vor.u32 %v1567_v38, %v1354_v39 }
  0x21   : > { %445 = vmatpush.bf16.msra.mxu0 %v1369_v19  ;;  %597 = vmatpush.bf16.msra.mxu3 %v1397_v30  ;;  %v1516_v43 = vld [vmem:[%s2427_s1 + $0x130] sm:$0xf]  ;;  %v1565_v45 = vld [vmem:[%s2427_s1 + $0x24] sm:$0xf]  ;;  %v1346_v46 = vld [vmem:[%s2427_s1 + $0x28] sm:$0xf0]  ;;  %s198_s5 = sadd.s32 %s1260_s9, %s1259_s20  ;;  %v1345_v52 = vor.u32 %v1566_v42, %v1344_v40 }
  0x22   : > { %543 = vmatpush.bf16.msra.mxu2 %v1373_v23  ;;  %499 = vmatpush.bf16.msra.mxu1 %v1393_v37  ;;  %v1600_v47 = vld [vmem:[%s2427_s1 + $0x134] sm:$0xf0]  ;;  %s1261_s6 = sshll.u32 %s198_s5, 2  ;;  %v1500_v49 = vld [vmem:[%s2427_s1 + $0x110] sm:$0xf]  ;;  %v1349_v55 = vor.u32 %v1565_v45, %v1346_v46  ;;  %s1601_s20 = sshll.u32 %s1757_s16, 6 }
  0x23   : > { %v1517_v48 = vor.u32 %v1600_v47, %v1516_v43  ;;  %v1596_v50 = vld [vmem:[%s2427_s1 + $0x114] sm:$0xf0]  ;;  %s1978_s4 = scalar_lea.vmem %s2426_s0, %s1261_s6  ;;  %v1336_v57 = vld [vmem:[%s2427_s1 + $0x10] sm:$0xf]  ;;  %v1563_v59 = vld [vmem:[%s2427_s1 + $0x14] sm:$0xf] }
  0x24   : > { %v1501_v51 = vor.u32 %v1596_v50, %v1500_v49  ;;  %v1545_v53 = vld [vmem:[%s1978_s4 + $0x4] sm:$0xf]  ;;  %v1266_v54 = vld [vmem:[%s1978_s4 + $0x8] sm:$0xf0]  ;;  %v1564_v58 = vld [vmem:[%s2427_s1 + $0x14] sm:$0xf0] }
  0x25   : > { %446 = vmatpush.bf16.msra.mxu0 %v1361_v32  ;;  %911 = vmatpush.bf16.msrb.mxu3 %v1517_v48  ;;  %v1982_v56 = vor.u32 %v1545_v53, %v1266_v54  ;;  %v1338_v60 = vld [vmem:[%s2427_s1 + $0x18] sm:$0xf0]  ;;  %v1492_v61 = vld [vmem:[%s2427_s1 + $0x100] sm:$0xf]  ;;  %v1594_v62 = vld [vmem:[%s2427_s1 + $0x104] sm:$0xf0]  ;;  %v1337_v63 = vor.u32 %v1564_v58, %v1336_v57 }
  0x26   : > { %544 = vmatpush.bf16.msra.mxu2 %v1365_v34  ;;  %856 = vmatpush.bf16.msrb.mxu1 %v1501_v51  ;;  %v1493_v0 = vor.u32 %v1594_v62, %v1492_v61  ;;  %v1341_v1 = vor.u32 %v1563_v59, %v1338_v60  ;;  %v1328_v2 = vld [vmem:[%s2427_s1] sm:$0xf]  ;;  %v1562_v3 = vld [vmem:[%s2427_s1 + $0x4] sm:$0xf0]  ;;  %v1561_v4 = vld [vmem:[%s2427_s1 + $0x4] sm:$0xf] }
  0x27   : > { %1414 = vmatmul.msk.bf16.vlgmr.msra.gmra.mxu3 %vm418_vm0, %v1982_v56  ;;  %1406 = vmatmul.msk.bf16.vlgmr.msra.gmra.mxu1 %vm418_vm0, %v1982_v56  ;;  %v1330_v5 = vld [vmem:[%s2427_s1 + $0x8] sm:$0xf0]  ;;  %v1595_v6 = vld [vmem:[%s2427_s1 + $0x114] sm:$0xf]  ;;  %v1502_v7 = vld [vmem:[%s2427_s1 + $0x118] sm:$0xf0]  ;;  %v1329_v10 = vor.u32 %v1562_v3, %v1328_v2 }
  0x28   : > { %v1599_v8 = vld [vmem:[%s2427_s1 + $0x134] sm:$0xf]  ;;  %v1518_v9 = vld [vmem:[%s2427_s1 + $0x138] sm:$0xf0]  ;;  %v1264_v11 = vld [vmem:[%s1978_s4] sm:$0xf]  ;;  %v1333_v13 = vor.u32 %v1561_v4, %v1330_v5  ;;  %v1505_v14 = vor.u32 %v1595_v6, %v1502_v7 }
  0x29   : > { %447 = vmatpush.bf16.msra.mxu0 %v1353_v41  ;;  %v1546_v12 = vld [vmem:[%s1978_s4 + $0x4] sm:$0xf0]  ;;  %v1521_v15 = vor.u32 %v1599_v8, %v1518_v9  ;;  %v1593_v16 = vld [vmem:[%s2427_s1 + $0x104] sm:$0xf]  ;;  %v1494_v17 = vld [vmem:[%s2427_s1 + $0x108] sm:$0xf0] }
  0x2a   : > { %545 = vmatpush.bf16.msra.mxu2 %v1357_v44  ;;  %857 = vmatpush.bf16.msrb.mxu1 %v1493_v0  ;;  %v2038_v18 = vor.u32 %v1546_v12, %v1264_v11  ;;  %v1547_v19 = vld [vmem:[%s1978_s4 + $0x14] sm:$0xf]  ;;  %v1274_v20 = vld [vmem:[%s1978_s4 + $0x18] sm:$0xf0]  ;;  %v1497_v21 = vor.u32 %v1593_v16, %v1494_v17  ;;  %v1484_v23 = vld [vmem:[%s2427_s1 + $0xf0] sm:$0xf] }
  0x2b   : > { %v2043_v22 = vor.u32 %v1547_v19, %v1274_v20  ;;  %v1592_v24 = vld [vmem:[%s2427_s1 + $0xf4] sm:$0xf0]  ;;  %v1591_v25 = vld [vmem:[%s2427_s1 + $0xf4] sm:$0xf]  ;;  %v1486_v27 = vld [vmem:[%s2427_s1 + $0xf8] sm:$0xf0] }
  0x2c   : > { %v1485_v26 = vor.u32 %v1592_v24, %v1484_v23  ;;  %v1489_v28 = vor.u32 %v1591_v25, %v1486_v27  ;;  %v1272_v29 = vld [vmem:[%s1978_s4 + $0x10] sm:$0xf]  ;;  %v1548_v30 = vld [vmem:[%s1978_s4 + $0x14] sm:$0xf0]  ;;  %v1549_v32 = vld [vmem:[%s1978_s4 + $0x24] sm:$0xf] }
  0x2d   : > { %448 = vmatpush.bf16.msra.mxu0 %v1345_v52  ;;  %v2064_v31 = vor.u32 %v1548_v30, %v1272_v29  ;;  %v1282_v33 = vld [vmem:[%s1978_s4 + $0x28] sm:$0xf0]  ;;  %v1476_v35 = vld [vmem:[%s2427_s1 + $0xe0] sm:$0xf]  ;;  %v1590_v36 = vld [vmem:[%s2427_s1 + $0xe4] sm:$0xf0] }
  0x2e   : > { %546 = vmatpush.bf16.msra.mxu2 %v1349_v55  ;;  %858 = vmatpush.bf16.msrb.mxu1 %v1485_v26  ;;  %v2069_v34 = vor.u32 %v1549_v32, %v1282_v33  ;;  %v1589_v37 = vld [vmem:[%s2427_s1 + $0xe4] sm:$0xf]  ;;  %v1477_v38 = vor.u32 %v1590_v36, %v1476_v35  ;;  %v1478_v39 = vld [vmem:[%s2427_s1 + $0xe8] sm:$0xf0]  ;;  %v1280_v41 = vld [vmem:[%s1978_s4 + $0x20] sm:$0xf] }
  0x2f   : > { %v1481_v40 = vor.u32 %v1589_v37, %v1478_v39  ;;  %v1550_v42 = vld [vmem:[%s1978_s4 + $0x24] sm:$0xf0]  ;;  %v1551_v44 = vld [vmem:[%s1978_s4 + $0x34] sm:$0xf]  ;;  %v1290_v45 = vld [vmem:[%s1978_s4 + $0x38] sm:$0xf0] }
  0x30   : > { %v2090_v43 = vor.u32 %v1550_v42, %v1280_v41  ;;  %v2095_v46 = vor.u32 %v1551_v44, %v1290_v45  ;;  %v1508_v47 = vld [vmem:[%s2427_s1 + $0x120] sm:$0xf]  ;;  %v1598_v48 = vld [vmem:[%s2427_s1 + $0x124] sm:$0xf0]  ;;  %v1597_v49 = vld [vmem:[%s2427_s1 + $0x124] sm:$0xf] }
  0x31   : > { %449 = vmatpush.bf16.msra.mxu0 %v1337_v63  ;;  %v1509_v50 = vor.u32 %v1598_v48, %v1508_v47  ;;  %v1510_v51 = vld [vmem:[%s2427_s1 + $0x128] sm:$0xf0]  ;;  %v1468_v52 = vld [vmem:[%s2427_s1 + $0xd0] sm:$0xf]  ;;  %v1588_v53 = vld [vmem:[%s2427_s1 + $0xd4] sm:$0xf0] }
  0x32   : > { %547 = vmatpush.bf16.msra.mxu2 %v1341_v1  ;;  %859 = vmatpush.bf16.msrb.mxu1 %v1477_v38  ;;  %v1513_v54 = vor.u32 %v1597_v49, %v1510_v51  ;;  %v1469_v55 = vor.u32 %v1588_v53, %v1468_v52  ;;  %v1587_v57 = vld [vmem:[%s2427_s1 + $0xd4] sm:$0xf]  ;;  %v1470_v58 = vld [vmem:[%s2427_s1 + $0xd8] sm:$0xf0]  ;;  %v1288_v60 = vld [vmem:[%s1978_s4 + $0x30] sm:$0xf] }
  0x33   : > { %v1473_v59 = vor.u32 %v1587_v57, %v1470_v58  ;;  %912 = vmatpush.bf16.msrb.mxu3 %v1509_v50  ;;  %v1552_v61 = vld [vmem:[%s1978_s4 + $0x34] sm:$0xf0]  ;;  %v1553_v63 = vld [vmem:[%s1978_s4 + $0x44] sm:$0xf]  ;;  %v1298_v0 = vld [vmem:[%s1978_s4 + $0x48] sm:$0xf0] }
  0x34   : > { %v2128_v62 = vor.u32 %v1552_v61, %v1288_v60  ;;  %v2133_v1 = vor.u32 %v1553_v63, %v1298_v0  ;;  %v1460_v2 = vld [vmem:[%s2427_s1 + $0xc0] sm:$0xf]  ;;  %v1586_v3 = vld [vmem:[%s2427_s1 + $0xc4] sm:$0xf0]  ;;  %v1585_v4 = vld [vmem:[%s2427_s1 + $0xc4] sm:$0xf] }
  0x35   : > { %450 = vmatpush.bf16.msra.mxu0 %v1329_v10  ;;  %v1461_v5 = vor.u32 %v1586_v3, %v1460_v2  ;;  %v1462_v6 = vld [vmem:[%s2427_s1 + $0xc8] sm:$0xf0]  ;;  %v1296_v8 = vld [vmem:[%s1978_s4 + $0x40] sm:$0xf]  ;;  %v1554_v9 = vld [vmem:[%s1978_s4 + $0x44] sm:$0xf0] }
  0x36   : > { %548 = vmatpush.bf16.msra.mxu2 %v1333_v13  ;;  %860 = vmatpush.bf16.msrb.mxu1 %v1469_v55  ;;  %v1465_v7 = vor.u32 %v1585_v4, %v1462_v6  ;;  %v2154_v10 = vor.u32 %v1554_v9, %v1296_v8  ;;  %v1555_v11 = vld [vmem:[%s1978_s4 + $0x54] sm:$0xf]  ;;  %v1306_v12 = vld [vmem:[%s1978_s4 + $0x58] sm:$0xf0]  ;;  %v1556_v23 = vld [vmem:[%s1978_s4 + $0x54] sm:$0xf0] }
  0x37   : > { %1415 = vmatmul.msk.bf16.gmra.mxu3 %vm418_vm0, %v2043_v22  ;;  %1407 = vmatmul.msk.bf16.gmra.mxu1 %vm418_vm0, %v2043_v22  ;;  %v2159_v13 = vor.u32 %v1555_v11, %v1306_v12  ;;  %v1583_v16 = vld [vmem:[%s2427_s1 + $0xb4] sm:$0xf]  ;;  %v1454_v19 = vld [vmem:[%s2427_s1 + $0xb8] sm:$0xf0]  ;;  %v1557_v25 = vld [vmem:[%s1978_s4 + $0x64] sm:$0xf] }
  0x38   : > { %451 = vmatmul.bf16.vlgmr.msra.gmra.mxu0 %v2038_v18  ;;  %v1457_v20 = vor.u32 %v1583_v16, %v1454_v19  ;;  %v1314_v26 = vld [vmem:[%s1978_s4 + $0x68] sm:$0xf0]  ;;  %v1582_v29 = vld [vmem:[%s2427_s1 + $0xa4] sm:$0xf0]  ;;  %v1581_v30 = vld [vmem:[%s2427_s1 + $0xa4] sm:$0xf] }
  0x39   : > { %954 = vmatpush.bf16.msrb.mxu0 %v1505_v14  ;;  %549 = vmatmul.bf16.vlgmr.msra.gmra.mxu2 %v2038_v18  ;;  %v1452_v14 = vld [vmem:[%s2427_s1 + $0xb0] sm:$0xf]  ;;  %v2185_v27 = vor.u32 %v1557_v25, %v1314_v26  ;;  %v1446_v33 = vld [vmem:[%s2427_s1 + $0xa8] sm:$0xf0]  ;;  %v1312_v36 = vld [vmem:[%s1978_s4 + $0x60] sm:$0xf] }
  0x3a   : > { %1009 = vmatpush.bf16.msrb.mxu2 %v1521_v15  ;;  %861 = vmatpush.bf16.msrb.mxu1 %v1461_v5  ;;  %v1584_v15 = vld [vmem:[%s2427_s1 + $0xb4] sm:$0xf0]  ;;  %v1449_v35 = vor.u32 %v1581_v30, %v1446_v33  ;;  %v1558_v37 = vld [vmem:[%s1978_s4 + $0x64] sm:$0xf0]  ;;  %v1559_v39 = vld [vmem:[%s1978_s4 + $0x74] sm:$0xf] }
  0x3b   : > { %v1453_v17 = vor.u32 %v1584_v15, %v1452_v14  ;;  %v2206_v38 = vor.u32 %v1558_v37, %v1312_v36  ;;  %v1320_v42 = vld [vmem:[%s1978_s4 + $0x70] sm:$0xf]  ;;  %v1560_v44 = vld [vmem:[%s1978_s4 + $0x74] sm:$0xf0]  ;;  %v220_v49 = vld [vmem:[%s2428_s2] sm:$0x3] }
  0x3c   : > { %v2220_v45 = vor.u32 %v1560_v44, %v1320_v42  ;;  %v2230_v51 = vperm.slane %v220_v49, 0  ;;  %v2236_v55 = vperm.slane %v220_v49, 1  ;;  %s1541_s27 = sshll.u32 %s1753_s15, 7 }
  0x3d   : > { %955 = vmatpush.bf16.msrb.mxu0 %v1497_v21  ;;  %v1304_v21 = vld [vmem:[%s1978_s4 + $0x50] sm:$0xf]  ;;  %s1161_s5 = sadd.s32 %s1601_s20, %s1541_s27  ;;  %s1695_s20 = scalar_lea.hbm %s2429_s3, 1024 }
  0x3e   : > { %1010 = vmatpush.bf16.msrb.mxu2 %v1513_v54  ;;  %862 = vmatpush.bf16.msrb.mxu1 %v1453_v17  ;;  %v2180_v24 = vor.u32 %v1556_v23, %v1304_v21  ;;  %s1542_s7 = sshll.u32 %s1161_s5, 2 }
  0x3f   : > { %s1163_s8 = scalar_lea.hbm %s2429_s3, %s1542_s7 }
  0x40   : > { %s1166_s10 = sshll.u32 %s1163_s8, 4  ;;  %s1167_s10 = int_to_ptr.hbm [resolvable:$true] %s1166_s10 }
  0x41   : > { %956 = vmatpush.bf16.msrb.mxu0 %v1489_v28  ;;  %v1444_v28 = vld [vmem:[%s2427_s1 + $0xa0] sm:$0xf]  ;;  %s1689_s21 = sshra.s32 %s1167_s10, 4  ;;  %s1690_s21 = int_to_ptr.hbm [resolvable:$true] %s1689_s21 }
  0x42   : > { %v1445_v32 = vor.u32 %v1582_v29, %v1444_v28  ;;  %s1691_s24 = scalar_lea.hbm %s1690_s21, 256  ;;  %p1696_p4 = scmp.lt.s32.totalorder %s1690_s21, %s2429_s3 }
  0x43   : > { %p1692_p0 = scmp.ne.s32.totalorder %s1690_s21, %s1691_s24  ;;  %p1697_p5 = scmp.lt.s32.totalorder %s1695_s20, %s1691_s24 }
  0x44   : > { %863 = vmatpush.bf16.msrb.mxu1 %v1445_v32 }
  0x45   : > { %957 = vmatpush.bf16.msrb.mxu0 %v1481_v40  ;;  %v1322_v40 = vld [vmem:[%s1978_s4 + $0x78] sm:$0xf0]  ;;  %s188_s4 = sand.u32 1, %s1745_s13   ;;  %p1693_p1 = pnand %p1692_p0, %p1844_p3 }
  0x46   : > { %v2211_v41 = vor.u32 %v1559_v39, %v1322_v40  ;;  %s1257_s29 = sshll.u32 %s188_s4, 8  ;;  %s1149_s11 = scalar_lea.sflag [#allocation3], %s188_s4 }
  0x47   : > { %1416 = vmatmul.msk.bf16.gmra.mxu3 %vm418_vm0, %v2069_v34  ;;  %1408 = vmatmul.msk.bf16.gmra.mxu1 %vm418_vm0, %v2069_v34  ;;  %s2247_s9 = scalar_lea.vmem [#allocation2], %s1257_s29  ;;  %p1694_p2 = pneg %p1693_p1 }
  0x48   : > { %456 = vmatmul.bf16.gmra.mxu0 %v2064_v31  ;;  %s1164_s6 = sshll.u32 %s2247_s9, 4  ;;  %p1698_p6 = por %p1697_p5, %p1696_p4  ;;  %s1165_s6 = int_to_ptr.vmem [resolvable:$true] %s1164_s6 }
  0x49   : > { %554 = vmatmul.bf16.gmra.mxu2 %v2064_v31  ;;  %958 = vmatpush.bf16.msrb.mxu0 %v1473_v59 }
  0x4a   : > { %p1699_p7 = pnand %p1698_p6, %p1694_p2 }
  0x4d   : > { %959 = vmatpush.bf16.msrb.mxu0 %v1465_v7 }
  0x51   : > { %960 = vmatpush.bf16.msrb.mxu0 %v1457_v20 }
  0x55   : > { %961 = vmatpush.bf16.msrb.mxu0 %v1449_v35 }
  0x57   : > { %1417 = vmatmul.msk.bf16.gmra.mxu3 %vm418_vm0, %v2095_v46  ;;  %1409 = vmatmul.msk.bf16.gmra.mxu1 %vm418_vm0, %v2095_v46 }
  0x58   : > { %461 = vmatmul.bf16.gmra.mxu0 %v2090_v43 }
  0x59   : > { %559 = vmatmul.bf16.gmra.mxu2 %v2090_v43 }
  0x67   : > { %1418 = vmatmul.msk.bf16.gmra.mxu3 %vm418_vm0, %v2133_v1  ;;  %1410 = vmatmul.msk.bf16.gmra.mxu1 %vm418_vm0, %v2133_v1 }
  0x68   : > { %466 = vmatmul.bf16.gmra.mxu0 %v2128_v62 }
  0x69   : > { %564 = vmatmul.bf16.gmra.mxu2 %v2128_v62 }
  0x77   : > { %1419 = vmatmul.msk.bf16.gmra.mxu3 %vm418_vm0, %v2159_v13  ;;  %1411 = vmatmul.msk.bf16.gmra.mxu1 %vm418_vm0, %v2159_v13 }
  0x78   : > { %471 = vmatmul.bf16.gmra.mxu0 %v2154_v10 }
  0x79   : > { %569 = vmatmul.bf16.gmra.mxu2 %v2154_v10 }
  0x87   : > { %1420 = vmatmul.msk.bf16.gmra.mxu3 %vm418_vm0, %v2185_v27  ;;  %1412 = vmatmul.msk.bf16.gmra.mxu1 %vm418_vm0, %v2185_v27 }
  0x88   : > { %476 = vmatmul.bf16.gmra.mxu0 %v2180_v24 }
  0x89   : > { %574 = vmatmul.bf16.gmra.mxu2 %v2180_v24 }
  0x97   : > { %1421 = vmatmul.msk.bf16.gmra.mxu3 %vm418_vm0, %v2211_v41  ;;  %1413 = vmatmul.msk.bf16.gmra.mxu1 %vm418_vm0, %v2211_v41 }
  0x98   : > { %481 = vmatmul.bf16.gmra.mxu0 %v2206_v38 }
  0x99   : > { %579 = vmatmul.bf16.gmra.mxu2 %v2206_v38 }
  0xa4   : > { %v501_v47 = vpop.f32.mrf.mxu1 }
  0xa7   : > { %1522 = vmatmul.msk.bf16.vlgmr.msrb.gmra.mxu3 %vm418_vm0, %v1982_v56  ;;  %864 = vmatmul.bf16.vlgmr.msrb.gmra.mxu1 %v2038_v18 }
  0xa8   : > { %486 = vmatmul.bf16.gmra.mxu0 %v2220_v45 }
  0xa9   : > { %584 = vmatmul.bf16.gmra.mxu2 %v2220_v45 }
  0xaa   : > { %v599_v48 = vpop.f32.mrf.mxu3 }
  0xac   : > { %v503_v50 = vpop.f32.mrf.mxu1 }
  0xb2   : > { %v601_v54 = vpop.f32.mrf.mxu3 }
  0xb4   : > { %v506_v57 = vpop.f32.mrf.mxu1 }
  0xb5   : > { %v452_v52 = vpop.f32.mrf.mxu0 }
  0xb6   : > { %v453_v53 = vadd.f32 %v452_v52, %v2230_v51 }
  0xb7   : > { %1523 = vmatmul.msk.bf16.gmra.mxu3 %vm418_vm0, %v2043_v22  ;;  %869 = vmatmul.bf16.gmra.mxu1 %v2064_v31 }
  0xb8   : > { %962 = vmatmul.bf16.vlgmr.msrb.gmra.mxu0 %v2038_v18  ;;  %v502_v58 = vadd.f32 %v501_v47, %v453_v53 }
  0xb9   : > { %1530 = vmatmul.msk.bf16.vlgmr.msrb.gmra.mxu2 %vm418_vm0, %v1982_v56 }
  0xba   : > { %v639_v63 = vmul.f32 0.1, %v502_v58  ;;  %v604_v2 = vpop.f32.mrf.mxu3 }
  0xbc   : > { %v550_v59 = vpop.f32.mrf.mxu2  ;;  %v508_v3 = vpop.f32.mrf.mxu1  ;;  %v671_v4 = vmax.f32 %v502_v58, %v639_v63 }
  0xbd   : > { %v551_v60 = vadd.f32 %v550_v59, %v2236_v55  ;;  %v454_v61 = vpop.f32.mrf.mxu0 }
  0xbe   : > { %v455_v18 = vadd.f32 %v454_v61, %v2230_v51 }
  0xbf   : > { %v600_v0 = vadd.f32 %v599_v48, %v551_v60 }
  0xc0   : > { %v504_v6 = vadd.f32 %v503_v50, %v455_v18 }
  0xc1   : > { %v640_v56 = vmul.f32 0.1, %v600_v0 }
  0xc2   : > { %v641_v12 = vmul.f32 0.1, %v504_v6  ;;  %v606_v16 = vpop.f32.mrf.mxu3 }
  0xc3   : > { %v672_v5 = vmax.f32 %v600_v0, %v640_v56 }
  0xc4   : > { %v552_v7 = vpop.f32.mrf.mxu2  ;;  %v511_v19 = vpop.f32.mrf.mxu1  ;;  %v673_v20 = vmax.f32 %v504_v6, %v641_v12 }
  0xc5   : > { %v703_v8 = vpack.c.bf16 %v672_v5, %v671_v4  ;;  %v553_v9 = vadd.f32 %v552_v7, %v2236_v55  ;;  %v457_v11 = vpop.f32.mrf.mxu0 }
  0xc6   : > { %v458_v15 = vadd.f32 %v457_v11, %v2230_v51 }
  0xc7   : > { %719 = vst [vmem:[%s2247_s9] sm:$0xff] %v703_v8  ;;  %v602_v14 = vadd.f32 %v601_v54, %v553_v9  ;;  %1524 = vmatmul.msk.bf16.gmra.mxu3 %vm418_vm0, %v2069_v34  ;;  %874 = vmatmul.bf16.gmra.mxu1 %v2090_v43 }
  0xc8   : > { %967 = vmatmul.bf16.gmra.mxu0 %v2064_v31  ;;  %v507_v23 = vadd.f32 %v506_v57, %v458_v15 }
  0xc9   : > { %v642_v17 = vmul.f32 0.1, %v602_v14  ;;  %1531 = vmatmul.msk.bf16.gmra.mxu2 %vm418_vm0, %v2043_v22 }
  0xca   : > { %v643_v31 = vmul.f32 0.1, %v507_v23  ;;  %v609_v32 = vpop.f32.mrf.mxu3 }
  0xcb   : > { %v674_v21 = vmax.f32 %v602_v14, %v642_v17 }
  0xcc   : > { %v555_v25 = vpop.f32.mrf.mxu2  ;;  %v513_v35 = vpop.f32.mrf.mxu1  ;;  %v675_v36 = vmax.f32 %v507_v23, %v643_v31 }
  0xcd   : > { %v704_v26 = vpack.c.bf16 %v674_v21, %v673_v20  ;;  %v556_v28 = vadd.f32 %v555_v25, %v2236_v55  ;;  %v459_v29 = vpop.f32.mrf.mxu0 }
  0xce   : > { %v460_v22 = vadd.f32 %v459_v29, %v2230_v51 }
  0xcf   : > { %720 = vst [vmem:[%s2247_s9 + $0x10] sm:$0xff] %v704_v26  ;;  %v605_v30 = vadd.f32 %v604_v2, %v556_v28 }
  0xd0   : > { %v509_v39 = vadd.f32 %v508_v3, %v460_v22 }
  0xd1   : > { %v644_v33 = vmul.f32 0.1, %v605_v30 }
  0xd2   : > { %v645_v48 = vmul.f32 0.1, %v509_v39  ;;  %v611_v52 = vpop.f32.mrf.mxu3 }
  0xd3   : > { %v676_v37 = vmax.f32 %v605_v30, %v644_v33 }
  0xd4   : > { %v557_v40 = vpop.f32.mrf.mxu2  ;;  %v516_v54 = vpop.f32.mrf.mxu1  ;;  %v677_v57 = vmax.f32 %v509_v39, %v645_v48 }
  0xd5   : > { %v705_v42 = vpack.c.bf16 %v676_v37, %v675_v36  ;;  %v558_v44 = vadd.f32 %v557_v40, %v2236_v55  ;;  %v462_v47 = vpop.f32.mrf.mxu0 }
  0xd6   : > { %v463_v50 = vadd.f32 %v462_v47, %v2230_v51 }
  0xd7   : > { %721 = vst [vmem:[%s2247_s9 + $0x20] sm:$0xff] %v705_v42  ;;  %v607_v49 = vadd.f32 %v606_v16, %v558_v44  ;;  %1525 = vmatmul.msk.bf16.gmra.mxu3 %vm418_vm0, %v2095_v46  ;;  %879 = vmatmul.bf16.gmra.mxu1 %v2128_v62 }
  0xd8   : > { %972 = vmatmul.bf16.gmra.mxu0 %v2090_v43  ;;  %v512_v59 = vadd.f32 %v511_v19, %v463_v50 }
  0xd9   : > { %v646_v53 = vmul.f32 0.1, %v607_v49  ;;  %1532 = vmatmul.msk.bf16.gmra.mxu2 %vm418_vm0, %v2069_v34 }
  0xda   : > { %v647_v43 = vmul.f32 0.1, %v512_v59  ;;  %v614_v2 = vpop.f32.mrf.mxu3 }
  0xdb   : > { %v678_v58 = vmax.f32 %v607_v49, %v646_v53 }
  0xdc   : > { %v560_v60 = vpop.f32.mrf.mxu2  ;;  %v518_v3 = vpop.f32.mrf.mxu1  ;;  %v679_v4 = vmax.f32 %v512_v59, %v647_v43 }
  0xdd   : > { %v706_v61 = vpack.c.bf16 %v678_v58, %v677_v57  ;;  %v561_v63 = vadd.f32 %v560_v60, %v2236_v55  ;;  %v464_v0 = vpop.f32.mrf.mxu0 }
  0xde   : > { %v465_v34 = vadd.f32 %v464_v0, %v2230_v51 }
  0xdf   : > { %722 = vst [vmem:[%s2247_s9 + $0x30] sm:$0xff] %v706_v61  ;;  %v610_v18 = vadd.f32 %v609_v32, %v561_v63 }
  0xe0   : > { %v514_v6 = vadd.f32 %v513_v35, %v465_v34 }
  0xe1   : > { %v648_v56 = vmul.f32 0.1, %v610_v18 }
  0xe2   : > { %v649_v12 = vmul.f32 0.1, %v514_v6  ;;  %v616_v16 = vpop.f32.mrf.mxu3 }
  0xe3   : > { %v680_v5 = vmax.f32 %v610_v18, %v648_v56 }
  0xe4   : > { %v562_v7 = vpop.f32.mrf.mxu2  ;;  %v521_v19 = vpop.f32.mrf.mxu1  ;;  %v681_v20 = vmax.f32 %v514_v6, %v649_v12 }
  0xe5   : > { %v707_v8 = vpack.c.bf16 %v680_v5, %v679_v4  ;;  %v563_v9 = vadd.f32 %v562_v7, %v2236_v55  ;;  %v467_v11 = vpop.f32.mrf.mxu0 }
  0xe6   : > { %v468_v15 = vadd.f32 %v467_v11, %v2230_v51 }
  0xe7   : > { %723 = vst [vmem:[%s2247_s9 + $0x40] sm:$0xff] %v707_v8  ;;  %v612_v14 = vadd.f32 %v611_v52, %v563_v9  ;;  %1526 = vmatmul.msk.bf16.gmra.mxu3 %vm418_vm0, %v2133_v1  ;;  %884 = vmatmul.bf16.gmra.mxu1 %v2154_v10 }
  0xe8   : > { %977 = vmatmul.bf16.gmra.mxu0 %v2128_v62  ;;  %v517_v23 = vadd.f32 %v516_v54, %v468_v15 }
  0xe9   : > { %v650_v17 = vmul.f32 0.1, %v612_v14  ;;  %1533 = vmatmul.msk.bf16.gmra.mxu2 %vm418_vm0, %v2095_v46 }
  0xea   : > { %v651_v62 = vmul.f32 0.1, %v517_v23  ;;  %v619_v30 = vpop.f32.mrf.mxu3 }
  0xeb   : > { %v682_v21 = vmax.f32 %v612_v14, %v650_v17 }
  0xec   : > { %v565_v25 = vpop.f32.mrf.mxu2  ;;  %v523_v32 = vpop.f32.mrf.mxu1  ;;  %v683_v33 = vmax.f32 %v517_v23, %v651_v62 }
  0xed   : > { %v708_v26 = vpack.c.bf16 %v682_v21, %v681_v20  ;;  %v566_v28 = vadd.f32 %v565_v25, %v2236_v55  ;;  %v469_v29 = vpop.f32.mrf.mxu0 }
  0xee   : > { %v470_v46 = vadd.f32 %v469_v29, %v2230_v51 }
  0xef   : > { %724 = vst [vmem:[%s2247_s9 + $0x50] sm:$0xff] %v708_v26  ;;  %v615_v31 = vadd.f32 %v614_v2, %v566_v28 }
  0xf0   : > { %v519_v36 = vadd.f32 %v518_v3, %v470_v46 }
  0xf1   : > { %v652_v22 = vmul.f32 0.1, %v615_v31 }
  0xf2   : > { %v653_v44 = vmul.f32 0.1, %v519_v36  ;;  %v621_v49 = vpop.f32.mrf.mxu3 }
  0xf3   : > { %v684_v35 = vmax.f32 %v615_v31, %v652_v22 }
  0xf4   : > { %v567_v37 = vpop.f32.mrf.mxu2  ;;  %v526_v52 = vpop.f32.mrf.mxu1  ;;  %v685_v53 = vmax.f32 %v519_v36, %v653_v44 }
  0xf5   : > { %v709_v39 = vpack.c.bf16 %v684_v35, %v683_v33  ;;  %v568_v40 = vadd.f32 %v567_v37, %v2236_v55  ;;  %v472_v42 = vpop.f32.mrf.mxu0 }
  0xf6   : > { %v473_v48 = vadd.f32 %v472_v42, %v2230_v51 }
  0xf7   : > { %725 = vst [vmem:[%s2247_s9 + $0x60] sm:$0xff] %v709_v39  ;;  %v617_v47 = vadd.f32 %v616_v16, %v568_v40  ;;  %1527 = vmatmul.msk.bf16.gmra.mxu3 %vm418_vm0, %v2159_v13  ;;  %889 = vmatmul.bf16.gmra.mxu1 %v2180_v24 }
  0xf8   : > { %982 = vmatmul.bf16.gmra.mxu0 %v2154_v10  ;;  %v522_v57 = vadd.f32 %v521_v19, %v473_v48 }
  0xf9   : > { %v654_v50 = vmul.f32 0.1, %v617_v47  ;;  %1534 = vmatmul.msk.bf16.gmra.mxu2 %vm418_vm0, %v2133_v1 }
  0xfa   : > { %v655_v10 = vmul.f32 0.1, %v522_v57  ;;  %v624_v0 = vpop.f32.mrf.mxu3 }
  0xfb   : > { %v686_v54 = vmax.f32 %v617_v47, %v654_v50 }
  0xfc   : > { %v570_v58 = vpop.f32.mrf.mxu2  ;;  %v528_v18 = vpop.f32.mrf.mxu1  ;;  %v687_v34 = vmax.f32 %v522_v57, %v655_v10 }
  0xfd   : > { %v710_v59 = vpack.c.bf16 %v686_v54, %v685_v53  ;;  %v571_v60 = vadd.f32 %v570_v58, %v2236_v55  ;;  %v474_v61 = vpop.f32.mrf.mxu0 }
  0xfe   : > { %v475_v1 = vadd.f32 %v474_v61, %v2230_v51 }
  0xff   : > { %726 = vst [vmem:[%s2247_s9 + $0x70] sm:$0xff] %v710_v59  ;;  %v620_v63 = vadd.f32 %v619_v30, %v571_v60 }
 0x100   : > { %v524_v56 = vadd.f32 %v523_v32, %v475_v1 }
 0x101   : > { %v656_v43 = vmul.f32 0.1, %v620_v63 }
 0x102   : > { %v657_v7 = vmul.f32 0.1, %v524_v56  ;;  %v626_v11 = vpop.f32.mrf.mxu3 }
 0x103   : > { %v688_v2 = vmax.f32 %v620_v63, %v656_v43 }
 0x104   : > { %v572_v3 = vpop.f32.mrf.mxu2  ;;  %v531_v14 = vpop.f32.mrf.mxu1  ;;  %v689_v15 = vmax.f32 %v524_v56, %v657_v7 }
 0x105   : > { %v711_v4 = vpack.c.bf16 %v688_v2, %v687_v34  ;;  %v573_v5 = vadd.f32 %v572_v3, %v2236_v55  ;;  %v477_v6 = vpop.f32.mrf.mxu0 }
 0x106   : > { %v478_v9 = vadd.f32 %v477_v6, %v2230_v51 }
 0x107   : > { %727 = vst [vmem:[%s2247_s9 + $0x80] sm:$0xff] %v711_v4  ;;  %v622_v8 = vadd.f32 %v621_v49, %v573_v5  ;;  %1528 = vmatmul.msk.bf16.gmra.mxu3 %vm418_vm0, %v2185_v27  ;;  %894 = vmatmul.bf16.gmra.mxu1 %v2206_v38 }
 0x108   : > { %987 = vmatmul.bf16.gmra.mxu0 %v2180_v24  ;;  %v527_v17 = vadd.f32 %v526_v52, %v478_v9 }
 0x109   : > { %v658_v12 = vmul.f32 0.1, %v622_v8  ;;  %1535 = vmatmul.msk.bf16.gmra.mxu2 %vm418_vm0, %v2159_v13 }
 0x10a   : > { %v659_v24 = vmul.f32 0.1, %v527_v17  ;;  %v629_v26 = vpop.f32.mrf.mxu3 }
 0x10b   : > { %v690_v16 = vmax.f32 %v622_v8, %v658_v12 }
 0x10c   : > { %v575_v19 = vpop.f32.mrf.mxu2  ;;  %v533_v29 = vpop.f32.mrf.mxu1  ;;  %v691_v62 = vmax.f32 %v527_v17, %v659_v24 }
 0x10d   : > { %v712_v20 = vpack.c.bf16 %v690_v16, %v689_v15  ;;  %v576_v21 = vadd.f32 %v575_v19, %v2236_v55  ;;  %v479_v23 = vpop.f32.mrf.mxu0 }
 0x10e   : > { %v480_v13 = vadd.f32 %v479_v23, %v2230_v51 }
 0x10f   : > { %728 = vst [vmem:[%s2247_s9 + $0x90] sm:$0xff] %v712_v20  ;;  %v625_v25 = vadd.f32 %v624_v0, %v576_v21 }
 0x110   : > { %v529_v46 = vadd.f32 %v528_v18, %v480_v13 }
 0x111   : > { %v660_v28 = vmul.f32 0.1, %v625_v25 }
 0x112   : > { %v661_v35 = vmul.f32 0.1, %v529_v46  ;;  %v631_v39 = vpop.f32.mrf.mxu3 }
 0x113   : > { %v692_v31 = vmax.f32 %v625_v25, %v660_v28 }
 0x114   : > { %v577_v30 = vpop.f32.mrf.mxu2  ;;  %v536_v42 = vpop.f32.mrf.mxu1  ;;  %v693_v44 = vmax.f32 %v529_v46, %v661_v35 }
 0x115   : > { %v713_v22 = vpack.c.bf16 %v692_v31, %v691_v62  ;;  %v578_v32 = vadd.f32 %v577_v30, %v2236_v55  ;;  %v482_v33 = vpop.f32.mrf.mxu0 }
 0x116   : > { %v483_v37 = vadd.f32 %v482_v33, %v2230_v51 }
 0x117   : > { %729 = vst [vmem:[%s2247_s9 + $0xa0] sm:$0xff] %v713_v22  ;;  %v627_v36 = vadd.f32 %v626_v11, %v578_v32  ;;  %1529 = vmatmul.msk.bf16.gmra.mxu3 %vm418_vm0, %v2211_v41  ;;  %899 = vmatmul.bf16.gmra.mxu1 %v2220_v45 }
 0x118   : > { %992 = vmatmul.bf16.gmra.mxu0 %v2206_v38  ;;  %v532_v48 = vadd.f32 %v531_v14, %v483_v37 }
 0x119   : > { %v662_v40 = vmul.f32 0.1, %v627_v36  ;;  %1536 = vmatmul.msk.bf16.gmra.mxu2 %vm418_vm0, %v2185_v27 }
 0x11a   : > { %v663_v38 = vmul.f32 0.1, %v532_v48  ;;  %v634_v57 = vpop.f32.mrf.mxu3 }
 0x11b   : > { %v694_v47 = vmax.f32 %v627_v36, %v662_v40 }
 0x11c   : > { %v580_v49 = vpop.f32.mrf.mxu2  ;;  %v538_v59 = vpop.f32.mrf.mxu1  ;;  %v695_v60 = vmax.f32 %v532_v48, %v663_v38 }
 0x11d   : > { %v714_v50 = vpack.c.bf16 %v694_v47, %v693_v44  ;;  %v581_v52 = vadd.f32 %v580_v49, %v2236_v55  ;;  %v484_v53 = vpop.f32.mrf.mxu0 }
 0x11e   : > { %v485_v27 = vadd.f32 %v484_v53, %v2230_v51 }
 0x11f   : > { %730 = vst [vmem:[%s2247_s9 + $0xb0] sm:$0xff] %v714_v50  ;;  %v630_v54 = vadd.f32 %v629_v26, %v581_v52 }
 0x120   : > { %v534_v10 = vadd.f32 %v533_v29, %v485_v27 }
 0x121   : > { %v664_v58 = vmul.f32 0.1, %v630_v54 }
 0x122   : > { %v665_v18 = vmul.f32 0.1, %v534_v10  ;;  %v636_v56 = vpop.f32.mrf.mxu3 }
 0x123   : > { %v696_v61 = vmax.f32 %v630_v54, %v664_v58 }
 0x124   : > { %v582_v63 = vpop.f32.mrf.mxu2  ;;  %v865_v4 = vpop.f32.mrf.mxu1  ;;  %v697_v5 = vmax.f32 %v534_v10, %v665_v18 }
 0x125   : > { %v715_v1 = vpack.c.bf16 %v696_v61, %v695_v60  ;;  %v583_v0 = vadd.f32 %v582_v63, %v2236_v55  ;;  %v487_v43 = vpop.f32.mrf.mxu0  ;;  %v866_v25 = vadd.f32 %v865_v4, %v2230_v51 }
 0x126   : > { %v488_v2 = vadd.f32 %v487_v43, %v2230_v51 }
 0x127   : > { %731 = vst [vmem:[%s2247_s9 + $0xc0] sm:$0xff] %v715_v1  ;;  %v632_v34 = vadd.f32 %v631_v39, %v583_v0 }
 0x128   : > { %997 = vmatmul.bf16.gmra.mxu0 %v2220_v45  ;;  %v537_v7 = vadd.f32 %v536_v42, %v488_v2 }
 0x129   : > { %v666_v3 = vmul.f32 0.1, %v632_v34  ;;  %1537 = vmatmul.msk.bf16.gmra.mxu2 %vm418_vm0, %v2211_v41 }
 0x12a   : > { %v667_v14 = vmul.f32 0.1, %v537_v7  ;;  %v914_v45 = vpop.f32.mrf.mxu3 }
 0x12b   : > { %v698_v6 = vmax.f32 %v632_v34, %v666_v3  ;;  %v915_v31 = vadd.f32 %v914_v45, %v866_v25 }
 0x12c   : > { %v585_v8 = vpop.f32.mrf.mxu2  ;;  %v867_v19 = vpop.f32.mrf.mxu1  ;;  %v699_v20 = vmax.f32 %v537_v7, %v667_v14 }
 0x12d   : > { %v716_v9 = vpack.c.bf16 %v698_v6, %v697_v5  ;;  %v586_v11 = vadd.f32 %v585_v8, %v2236_v55  ;;  %v489_v12 = vpop.f32.mrf.mxu0  ;;  %v1052_v36 = vmul.f32 0.1, %v915_v31  ;;  %v868_v39 = vadd.f32 %v867_v19, %v2230_v51 }
 0x12e   : > { %v490_v16 = vadd.f32 %v489_v12, %v2230_v51 }
 0x12f   : > { %732 = vst [vmem:[%s2247_s9 + $0xd0] sm:$0xff] %v716_v9  ;;  %v635_v15 = vadd.f32 %v634_v57, %v586_v11  ;;  %v1084_v48 = vmax.f32 %v915_v31, %v1052_v36 }
 0x130   : > { %v539_v21 = vadd.f32 %v538_v59, %v490_v16 }
 0x131   : > { %v668_v17 = vmul.f32 0.1, %v635_v15 }
 0x132   : > { %v669_v28 = vmul.f32 0.1, %v539_v21  ;;  %v916_v62 = vpop.f32.mrf.mxu3 }
 0x133   : > { %v700_v41 = vmax.f32 %v635_v15, %v668_v17  ;;  %v917_v49 = vadd.f32 %v916_v62, %v868_v39 }
 0x134   : > { %v587_v23 = vpop.f32.mrf.mxu2  ;;  %v870_v22 = vpop.f32.mrf.mxu1  ;;  %v701_v32 = vmax.f32 %v539_v21, %v669_v28 }
 0x135   : > { %v717_v24 = vpack.c.bf16 %v700_v41, %v699_v20  ;;  %v588_v13 = vadd.f32 %v587_v23, %v2236_v55  ;;  %v963_v26 = vpop.f32.mrf.mxu0  ;;  %v1054_v27 = vmul.f32 0.1, %v917_v49  ;;  %v871_v57 = vadd.f32 %v870_v22, %v2230_v51 }
 0x136   : > { %v964_v30 = vadd.f32 %v963_v26, %v2236_v55 }
 0x137   : > { %733 = vst [vmem:[%s2247_s9 + $0xe0] sm:$0xff] %v717_v24  ;;  %v637_v29 = vadd.f32 %v636_v56, %v588_v13  ;;  %v1086_v10 = vmax.f32 %v917_v49, %v1054_v27 }
 0x139   : > { %v670_v46 = vmul.f32 0.1, %v637_v29 }
 0x13a   : > { %v919_v47 = vpop.f32.mrf.mxu3 }
 0x13b   : > { %v702_v33 = vmax.f32 %v637_v29, %v670_v46  ;;  %v920_v63 = vadd.f32 %v919_v47, %v871_v57 }
 0x13c   : > { %v1012_v35 = vpop.f32.mrf.mxu2  ;;  %v872_v52 = vpop.f32.mrf.mxu1 }
 0x13d   : > { %v718_v37 = vpack.c.bf16 %v702_v33, %v701_v32  ;;  %v1013_v40 = vadd.f32 %v1012_v35, %v964_v30  ;;  %v965_v42 = vpop.f32.mrf.mxu0  ;;  %v1056_v2 = vmul.f32 0.1, %v920_v63  ;;  %v873_v56 = vadd.f32 %v872_v52, %v2230_v51 }
 0x13e   : > { %v966_v38 = vadd.f32 %v965_v42, %v2236_v55 }
 0x13f   : > { %734 = vst [vmem:[%s2247_s9 + $0xf0] sm:$0xff] %v718_v37  ;;  %v1053_v44 = vmul.f32 0.1, %v1013_v40  ;;  %v1088_v7 = vmax.f32 %v920_v63, %v1056_v2 }
 0x141   : > { %v1085_v50 = vmax.f32 %v1013_v40, %v1053_v44 }
 0x142   : > { %v921_v61 = vpop.f32.mrf.mxu3 }
 0x143   : > { %v1116_v53 = vpack.c.bf16 %v1085_v50, %v1084_v48  ;;  %v922_v8 = vadd.f32 %v921_v61, %v873_v56 }
 0x144   : > { %v1014_v54 = vpop.f32.mrf.mxu2  ;;  %v875_v43 = vpop.f32.mrf.mxu1 }
 0x145   : > { %1132 = vst [vmem:[%s2247_s9 + $0x8] sm:$0xff] %v1116_v53  ;;  %v1015_v58 = vadd.f32 %v1014_v54, %v966_v38  ;;  %v968_v59 = vpop.f32.mrf.mxu0  ;;  %v1058_v16 = vmul.f32 0.1, %v922_v8  ;;  %v876_v45 = vadd.f32 %v875_v43, %v2230_v51 }
 0x146   : > { %v969_v0 = vadd.f32 %v968_v59, %v2236_v55 }
 0x147   : > { %v1055_v60 = vmul.f32 0.1, %v1015_v58  ;;  %v1090_v21 = vmax.f32 %v922_v8, %v1058_v16 }
 0x149   : > { %v1087_v1 = vmax.f32 %v1015_v58, %v1055_v60 }
 0x14a   : > { %v924_v6 = vpop.f32.mrf.mxu3 }
 0x14b   : > { %v1117_v18 = vpack.c.bf16 %v1087_v1, %v1086_v10  ;;  %v925_v23 = vadd.f32 %v924_v6, %v876_v45 }
 0x14c   : > { %v1017_v34 = vpop.f32.mrf.mxu2  ;;  %v877_v11 = vpop.f32.mrf.mxu1 }
 0x14d   : > { %1133 = vst [vmem:[%s2247_s9 + $0x18] sm:$0xff] %v1117_v18  ;;  %v1018_v3 = vadd.f32 %v1017_v34, %v969_v0  ;;  %v970_v4 = vpop.f32.mrf.mxu0  ;;  %v1060_v29 = vmul.f32 0.1, %v925_v23  ;;  %v878_v62 = vadd.f32 %v877_v11, %v2230_v51 }
 0x14e   : > { %v971_v14 = vadd.f32 %v970_v4, %v2236_v55 }
 0x14f   : > { %v1057_v5 = vmul.f32 0.1, %v1018_v3  ;;  %v1092_v32 = vmax.f32 %v925_v23, %v1060_v29 }
 0x151   : > { %v1089_v9 = vmax.f32 %v1018_v3, %v1057_v5 }
 0x152   : > { %v926_v41 = vpop.f32.mrf.mxu3 }
 0x153   : > { %v1118_v12 = vpack.c.bf16 %v1089_v9, %v1088_v7  ;;  %v927_v33 = vadd.f32 %v926_v41, %v878_v62 }
 0x154   : > { %v1019_v15 = vpop.f32.mrf.mxu2  ;;  %v880_v13 = vpop.f32.mrf.mxu1 }
 0x155   : > { %1134 = vst [vmem:[%s2247_s9 + $0x28] sm:$0xff] %v1118_v12  ;;  %v1020_v17 = vadd.f32 %v1019_v15, %v971_v14  ;;  %v973_v19 = vpop.f32.mrf.mxu0  ;;  %v1062_v42 = vmul.f32 0.1, %v927_v33  ;;  %v881_v44 = vadd.f32 %v880_v13, %v2230_v51 }
 0x156   : > { %v974_v25 = vadd.f32 %v973_v19, %v2236_v55 }
 0x157   : > { %v1059_v20 = vmul.f32 0.1, %v1020_v17  ;;  %v1094_v52 = vmax.f32 %v927_v33, %v1062_v42 }
 0x159   : > { %v1091_v24 = vmax.f32 %v1020_v17, %v1059_v20 }
 0x15a   : > { %v929_v22 = vpop.f32.mrf.mxu3 }
 0x15b   : > { %v1119_v26 = vpack.c.bf16 %v1091_v24, %v1090_v21  ;;  %v930_v53 = vadd.f32 %v929_v22, %v881_v44 }
 0x15c   : > { %v1022_v28 = vpop.f32.mrf.mxu2  ;;  %v882_v36 = vpop.f32.mrf.mxu1 }
 0x15d   : > { %1135 = vst [vmem:[%s2247_s9 + $0x38] sm:$0xff] %v1119_v26  ;;  %v1023_v31 = vadd.f32 %v1022_v28, %v974_v25  ;;  %v975_v46 = vpop.f32.mrf.mxu0  ;;  %v1064_v59 = vmul.f32 0.1, %v930_v53  ;;  %v883_v60 = vadd.f32 %v882_v36, %v2230_v51 }
 0x15e   : > { %v976_v39 = vadd.f32 %v975_v46, %v2236_v55 }
 0x15f   : > { %v1061_v30 = vmul.f32 0.1, %v1023_v31  ;;  %v1096_v0 = vmax.f32 %v930_v53, %v1064_v59 }
 0x161   : > { %v1093_v35 = vmax.f32 %v1023_v31, %v1061_v30 }
 0x162   : > { %v931_v50 = vpop.f32.mrf.mxu3 }
 0x163   : > { %v1120_v37 = vpack.c.bf16 %v1093_v35, %v1092_v32  ;;  %v932_v43 = vadd.f32 %v931_v50, %v883_v60 }
 0x164   : > { %v1024_v40 = vpop.f32.mrf.mxu2  ;;  %v885_v27 = vpop.f32.mrf.mxu1 }
 0x165   : > { %1136 = vst [vmem:[%s2247_s9 + $0x48] sm:$0xff] %v1120_v37  ;;  %v1025_v47 = vadd.f32 %v1024_v40, %v976_v39  ;;  %v978_v48 = vpop.f32.mrf.mxu0  ;;  %v1066_v4 = vmul.f32 0.1, %v932_v43  ;;  %v886_v5 = vadd.f32 %v885_v27, %v2230_v51 }
 0x166   : > { %v979_v54 = vadd.f32 %v978_v48, %v2236_v55 }
 0x167   : > { %v1063_v49 = vmul.f32 0.1, %v1025_v47  ;;  %v1098_v11 = vmax.f32 %v932_v43, %v1066_v4 }
 0x169   : > { %v1095_v38 = vmax.f32 %v1025_v47, %v1063_v49 }
 0x16a   : > { %v934_v1 = vpop.f32.mrf.mxu3 }
 0x16b   : > { %v1121_v57 = vpack.c.bf16 %v1095_v38, %v1094_v52  ;;  %v935_v12 = vadd.f32 %v934_v1, %v886_v5 }
 0x16c   : > { %v1027_v58 = vpop.f32.mrf.mxu2  ;;  %v887_v34 = vpop.f32.mrf.mxu1 }
 0x16d   : > { %1137 = vst [vmem:[%s2247_s9 + $0x58] sm:$0xff] %v1121_v57  ;;  %v1028_v61 = vadd.f32 %v1027_v58, %v979_v54  ;;  %v980_v10 = vpop.f32.mrf.mxu0  ;;  %v1068_v19 = vmul.f32 0.1, %v935_v12  ;;  %v888_v20 = vadd.f32 %v887_v34, %v2230_v51 }
 0x16e   : > { %v981_v56 = vadd.f32 %v980_v10, %v2236_v55 }
 0x16f   : > { %v1065_v63 = vmul.f32 0.1, %v1028_v61  ;;  %v1100_v25 = vmax.f32 %v935_v12, %v1068_v19 }
 0x171   : > { %v1097_v18 = vmax.f32 %v1028_v61, %v1065_v63 }
 0x172   : > { %v936_v9 = vpop.f32.mrf.mxu3 }
 0x173   : > { %v1122_v2 = vpack.c.bf16 %v1097_v18, %v1096_v0  ;;  %v937_v13 = vadd.f32 %v936_v9, %v888_v20 }
 0x174   : > { %v1029_v3 = vpop.f32.mrf.mxu2  ;;  %v890_v16 = vpop.f32.mrf.mxu1 }
 0x175   : > { %1138 = vst [vmem:[%s2247_s9 + $0x68] sm:$0xff] %v1122_v2  ;;  %v1030_v6 = vadd.f32 %v1029_v3, %v981_v56  ;;  %v983_v7 = vpop.f32.mrf.mxu0  ;;  %v1070_v46 = vmul.f32 0.1, %v937_v13  ;;  %v891_v30 = vadd.f32 %v890_v16, %v2230_v51 }
 0x176   : > { %v984_v15 = vadd.f32 %v983_v7, %v2236_v55 }
 0x177   : > { %v1067_v8 = vmul.f32 0.1, %v1030_v6  ;;  %v1102_v36 = vmax.f32 %v937_v13, %v1070_v46 }
 0x179   : > { %v1099_v14 = vmax.f32 %v1030_v6, %v1067_v8 }
 0x17a   : > { %v939_v24 = vpop.f32.mrf.mxu3 }
 0x17b   : > { %v1123_v45 = vpack.c.bf16 %v1099_v14, %v1098_v11  ;;  %v940_v37 = vadd.f32 %v939_v24, %v891_v30 }
 0x17c   : > { %v1032_v17 = vpop.f32.mrf.mxu2  ;;  %v892_v28 = vpop.f32.mrf.mxu1 }
 0x17d   : > { %1139 = vst [vmem:[%s2247_s9 + $0x78] sm:$0xff] %v1123_v45  ;;  %v1033_v41 = vadd.f32 %v1032_v17, %v984_v15  ;;  %v985_v21 = vpop.f32.mrf.mxu0  ;;  %v1072_v48 = vmul.f32 0.1, %v940_v37  ;;  %v893_v49 = vadd.f32 %v892_v28, %v2230_v51 }
 0x17e   : > { %v986_v62 = vadd.f32 %v985_v21, %v2236_v55 }
 0x17f   : > { %v1069_v23 = vmul.f32 0.1, %v1033_v41  ;;  %v1104_v54 = vmax.f32 %v940_v37, %v1072_v48 }
 0x181   : > { %v1101_v26 = vmax.f32 %v1033_v41, %v1069_v23 }
 0x182   : > { %v941_v35 = vpop.f32.mrf.mxu3 }
 0x183   : > { %v1124_v29 = vpack.c.bf16 %v1101_v26, %v1100_v25  ;;  %v942_v27 = vadd.f32 %v941_v35, %v893_v49 }
 0x184   : > { %v1034_v31 = vpop.f32.mrf.mxu2  ;;  %v895_v47 = vpop.f32.mrf.mxu1 }
 0x185   : > { %1140 = vst [vmem:[%s2247_s9 + $0x88] sm:$0xff] %v1124_v29  ;;  %v1035_v22 = vadd.f32 %v1034_v31, %v986_v62  ;;  %v988_v32 = vpop.f32.mrf.mxu0  ;;  %v1074_v61 = vmul.f32 0.1, %v942_v27  ;;  %v896_v10 = vadd.f32 %v895_v47, %v2230_v51 }
 0x186   : > { %v989_v40 = vadd.f32 %v988_v32, %v2236_v55 }
 0x187   : > { %v1071_v33 = vmul.f32 0.1, %v1035_v22  ;;  %v1106_v18 = vmax.f32 %v942_v27, %v1074_v61 }
 0x189   : > { %v1103_v39 = vmax.f32 %v1035_v22, %v1071_v33 }
 0x18a   : > { %v944_v38 = vpop.f32.mrf.mxu3 }
 0x18b   : > { %v1125_v42 = vpack.c.bf16 %v1103_v39, %v1102_v36  ;;  %v945_v34 = vadd.f32 %v944_v38, %v896_v10 }
 0x18c   : > { %v1037_v44 = vpop.f32.mrf.mxu2  ;;  %v897_v0 = vpop.f32.mrf.mxu1 }
 0x18d   : > { %1141 = vst [vmem:[%s2247_s9 + $0x98] sm:$0xff] %v1125_v42  ;;  %v1038_v50 = vadd.f32 %v1037_v44, %v989_v40  ;;  %v990_v52 = vpop.f32.mrf.mxu0  ;;  %v1076_v6 = vmul.f32 0.1, %v945_v34  ;;  %v898_v7 = vadd.f32 %v897_v0, %v2230_v51 }
 0x18e   : > { %v991_v59 = vadd.f32 %v990_v52, %v2236_v55 }
 0x18f   : > { %v1073_v53 = vmul.f32 0.1, %v1038_v50  ;;  %v1108_v14 = vmax.f32 %v945_v34, %v1076_v6 }
 0x191   : > { %v1105_v57 = vmax.f32 %v1038_v50, %v1073_v53 }
 0x192   : > { %v946_v3 = vpop.f32.mrf.mxu3 }
 0x193   : > { %v1126_v58 = vpack.c.bf16 %v1105_v57, %v1104_v54  ;;  %v947_v15 = vadd.f32 %v946_v3, %v898_v7 }
 0x194   : > { %v1039_v60 = vpop.f32.mrf.mxu2  ;;  %v900_v12 = vpop.f32.mrf.mxu1 }
 0x195   : > { %1142 = vst [vmem:[%s2247_s9 + $0xa8] sm:$0xff] %v1126_v58  ;;  %v1040_v63 = vadd.f32 %v1039_v60, %v991_v59  ;;  %v993_v1 = vpop.f32.mrf.mxu0  ;;  %v1078_v41 = vmul.f32 0.1, %v947_v15  ;;  %v901_v21 = vadd.f32 %v900_v12, %v2230_v51 }
 0x196   : > { %v994_v56 = vadd.f32 %v993_v1, %v2236_v55 }
 0x197   : > { %v1075_v43 = vmul.f32 0.1, %v1040_v63  ;;  %v1110_v13 = vmax.f32 %v947_v15, %v1078_v41 }
 0x199   : > { %v1107_v2 = vmax.f32 %v1040_v63, %v1075_v43 }
 0x19a   : > { %v949_v19 = vpop.f32.mrf.mxu3 }
 0x19b   : > { %v1127_v4 = vpack.c.bf16 %v1107_v2, %v1106_v18  ;;  %v950_v26 = vadd.f32 %v949_v19, %v901_v21 }
 0x19c   : > { %v1042_v5 = vpop.f32.mrf.mxu2  ;;  %v902_v62 = vpop.f32.mrf.mxu1 }
 0x19d   : > { %1143 = vst [vmem:[%s2247_s9 + $0xb8] sm:$0xff] %v1127_v4  ;;  %v1043_v8 = vadd.f32 %v1042_v5, %v994_v56  ;;  %v995_v9 = vpop.f32.mrf.mxu0  ;;  %v1080_v30 = vmul.f32 0.1, %v950_v26  ;;  %v903_v22 = vadd.f32 %v902_v62, %v2230_v51 }
 0x19e   : > { %v996_v17 = vadd.f32 %v995_v9, %v2236_v55 }
 0x19f   : > { %v1077_v11 = vmul.f32 0.1, %v1043_v8  ;;  %v1112_v37 = vmax.f32 %v950_v26, %v1080_v30 }
 0x1a1   : > { %v1109_v16 = vmax.f32 %v1043_v8, %v1077_v11 }
 0x1a2   : > { %v951_v33 = vpop.f32.mrf.mxu3 }
 0x1a3   : > { %v1128_v45 = vpack.c.bf16 %v1109_v16, %v1108_v14  ;;  %v952_v39 = vadd.f32 %v951_v33, %v903_v22 }
 0x1a4   : > { %v1044_v20 = vpop.f32.mrf.mxu2 }
 0x1a5   : > { %1144 = vst [vmem:[%s2247_s9 + $0xc8] sm:$0xff] %v1128_v45  ;;  %v1045_v23 = vadd.f32 %v1044_v20, %v996_v17  ;;  %v998_v24 = vpop.f32.mrf.mxu0  ;;  %v1082_v51 = vmul.f32 0.1, %v952_v39 }
 0x1a6   : > { %v999_v29 = vadd.f32 %v998_v24, %v2236_v55 }
 0x1a7   : > { %v1079_v25 = vmul.f32 0.1, %v1045_v23  ;;  %v1114_v50 = vmax.f32 %v952_v39, %v1082_v51 }
 0x1a9   : > { %v1111_v28 = vmax.f32 %v1045_v23, %v1079_v25 }
 0x1ab   : > { %v1129_v31 = vpack.c.bf16 %v1111_v28, %v1110_v13 }
 0x1ac   : > { %v1047_v46 = vpop.f32.mrf.mxu2 }
 0x1ad   : > { %1145 = vst [vmem:[%s2247_s9 + $0xd8] sm:$0xff] %v1129_v31  ;;  %v1048_v32 = vadd.f32 %v1047_v46, %v999_v29  ;;  %v1000_v36 = vpop.f32.mrf.mxu0 }
 0x1ae   : > { %v1001_v44 = vadd.f32 %v1000_v36, %v2236_v55 }
 0x1af   : > { %v1081_v35 = vmul.f32 0.1, %v1048_v32 }
 0x1b1   : > { %v1113_v40 = vmax.f32 %v1048_v32, %v1081_v35 }
 0x1b3   : > { %v1130_v42 = vpack.c.bf16 %v1113_v40, %v1112_v37 }
 0x1b4   : > { %v1049_v47 = vpop.f32.mrf.mxu2 }
 0x1b5   : > { %1146 = vst [vmem:[%s2247_s9 + $0xe8] sm:$0xff] %v1130_v42  ;;  %v1050_v48 = vadd.f32 %v1049_v47, %v1001_v44 }
 0x1b7   : > { %v1083_v49 = vmul.f32 0.1, %v1050_v48 }
 0x1b9   : > { %v1115_v52 = vmax.f32 %v1050_v48, %v1083_v49 }
 0x1bb   : > { %v1131_v53 = vpack.c.bf16 %v1115_v52, %v1114_v50 }
 0x1bd   : > { %1147 = vst [vmem:[%s2247_s9 + $0xf8] sm:$0xff] %v1131_v53 }
 0x1be   : > { %1702 = shalt.err (!%p1699_p7)
}
 0x1bf   : > { %s1771_s4 = smov 256   ;;  %s1772_s9 = smov 16  }
 0x1c0   : > { %1602 = dma.vmem_to_hbm [thread:$0]  (%p1844_p3), %s1165_s6, 4096, %s1167_s10, %s1149_s11, %s1771_s4, %s1771_s4, %s1772_s9  }
 0x1c1 PF: > { %p1608_p9 = scmp.ge.s32.totalorder %s1769_s19, 2  ;;  %s1181_s7 = sand.u32 1, %s1741_s12  }
 0x1c2   : > { %s1182_s15 = scalar_lea.sflag [#allocation3], %s1181_s7 }
 0x1c3   : > { %p1605_p10 = pnand %p1608_p9, %p1853_p8 }
 0x1c5   : > { %p1606_p11 = pneg %p1605_p10 }
 0x1c7   : > { %1736 = dma.done.wait (%p1606_p11), %s1182_s15, 4096  }
 0x1c8   : > { %1738 = vsyncadd (%p1606_p11), %s1182_s15, 4294963200  ;;  %s16_s19 = sadd.s32 1, %s1769_s19   ;;  %s2432_s12 = smov %s1745_s13 }
 0x1c9   : > { %p13_p12 = scmp.ge.s32.totalorder %s16_s19, 6   ;;  %s2433_s13 = smov %s1749_s14 }
 0x1ca   : > { %s2434_s14 = smov %s1862_s30  ;;  %s2435_s15 = smov %s1761_s17 }
 0x1cb   : > { %s2436_s16 = smov %s1765_s18  ;;  %s2437_s17 = smov %s2440_s22 }
 0x1cc   : > { %s2438_s18 = smov %s2444_s23  ;;  %15 = sbr.rel (!%p13_p12) target bundleno = 5 (0x5), region = 68 }
 0x1d1   :  { %1188 = vsyncpa [#allocation3], 1 }
 0x1d2   :  { %1190 = vsyncpa [#allocation3 + $0x1], 1 }

</bundles_post_ra>
